<compile_context>
chip_gen: v5e
topology: v5e:2x2
jax: 0.10.0
libtpu: 0.0.40
codegen_flags: <defaults>
</compile_context>

<pallas_src>
import jax
import jax.numpy as jnp
from jax.experimental import pallas as pl
from jax.experimental.pallas import tpu as pltpu

D_IN, D_H1, D_H2, D_H3, D_OUT = 784, 128, 64, 32, 10


def mlp_kernel(x_ref, w1_ref, b1_ref, w2_ref, b2_ref, w34_ref, b34_ref, o_ref):
    # x tile: (TM, 784) bf16; weights bf16; biases f32; all matmuls accumulate in f32.
    x = x_ref[...]

    h1 = jnp.dot(x, w1_ref[...], preferred_element_type=jnp.float32) + b1_ref[...]
    h1 = jnp.maximum(h1, 0.0).astype(jnp.bfloat16)          # relu(fc1), narrowed for MXU

    h2 = jnp.dot(h1, w2_ref[...], preferred_element_type=jnp.float32) + b2_ref[...]
    h2 = jnp.maximum(h2, 0.0).astype(jnp.bfloat16)          # relu(fc2), narrowed for MXU

    # fc3 (no activation) and fc4 folded into a single matmul.
    out = jnp.dot(h2, w34_ref[...], preferred_element_type=jnp.float32) + b34_ref[...]
    o_ref[...] = out.astype(o_ref.dtype)


def _round_up(n, m):
    return ((n + m - 1) // m) * m


def simple_nn_forward(x, params, *, tm=1024):
    """x: any shape whose trailing dims flatten to 784 (e.g. (B, 1, 28, 28))."""
    x2d = x.reshape(-1, D_IN)
    B = x2d.shape[0]
    (w1, b1), (w2, b2), (w3, b3), (w4, b4) = params

    # --- parameter prep (outside the kernel, f32) ---------------------------------
    w3f, w4f = w3.astype(jnp.float32), w4.astype(jnp.float32)
    w34 = w3f @ w4f                                            # (64, 10)
    b34 = b3.astype(jnp.float32) @ w4f + b4.astype(jnp.float32)  # (1, 10)

    # MXU operands in bf16; biases stay f32.
    x_bf = x2d.astype(jnp.bfloat16)
    w1_bf = w1.astype(jnp.bfloat16)
    w2_bf = w2.astype(jnp.bfloat16)
    w34_bf = w34.astype(jnp.bfloat16)
    b1_f, b2_f = b1.astype(jnp.float32), b2.astype(jnp.float32)

    # --- batch tiling --------------------------------------------------------------
    tm_eff = min(tm, max(8, _round_up(B, 8)))   # multiple of 8 (f32 sublane)
    b_pad = _round_up(B, tm_eff)
    if b_pad != B:
        x_bf = jnp.pad(x_bf, ((0, b_pad - B), (0, 0)))
    grid = (b_pad // tm_eff,)

    const = lambda i: (0, 0)                    # weights/biases stay resident
    in_specs = [
        pl.BlockSpec((tm_eff, D_IN), lambda i: (i, 0)),
        pl.BlockSpec((D_IN, D_H1), const),
        pl.BlockSpec((1, D_H1), const),
        pl.BlockSpec((D_H1, D_H2), const),
        pl.BlockSpec((1, D_H2), const),
        pl.BlockSpec((D_H2, D_OUT), const),
        pl.BlockSpec((1, D_OUT), const),
    ]
    out_specs = pl.BlockSpec((tm_eff, D_OUT), lambda i: (i, 0))

    flops = 2 * b_pad * (D_IN * D_H1 + D_H1 * D_H2 + D_H2 * D_OUT)
    bytes_accessed = (
        b_pad * D_IN * 2                                    # x (bf16)
        + (D_IN * D_H1 + D_H1 * D_H2 + D_H2 * D_OUT) * 2    # weights (bf16)
        + (D_H1 + D_H2 + D_OUT) * 4                         # biases (f32)
        + b_pad * D_OUT * 4                                 # output (f32)
    )

    out = pl.pallas_call(
        mlp_kernel,
        out_shape=jax.ShapeDtypeStruct((b_pad, D_OUT), jnp.float32),
        grid=grid,
        in_specs=in_specs,
        out_specs=out_specs,
        compiler_params=pltpu.CompilerParams(
            dimension_semantics=("parallel",),
            vmem_limit_bytes=32 * 1024 * 1024,
        ),
        cost_estimate=pl.CostEstimate(
            flops=flops, transcendentals=0, bytes_accessed=bytes_accessed
        ),
    )(x_bf, w1_bf, b1_f, w2_bf, b2_f, w34_bf, b34)

    return out[:B]


def init_params(key):
    """Deterministic init matching torch.nn.Linear shapes (weights stored as
    (in, out); biases as (1, out) so they broadcast cleanly on TPU)."""
    dims = [(D_IN, D_H1), (D_H1, D_H2), (D_H2, D_H3), (D_H3, D_OUT)]
    params = []
    for (din, dout) in dims:
        key, kw, kb = jax.random.split(key, 3)
        bound = 1.0 / jnp.sqrt(din)
        w = jax.random.uniform(kw, (din, dout), jnp.float32, -bound, bound)
        b = jax.random.uniform(kb, (1, dout), jnp.float32, -bound, bound)
        params.append((w, b))
    return params


def reference_forward(x, params):
    """Pure-f32 reference matching the PyTorch forward exactly."""
    h = x.reshape(-1, D_IN).astype(jnp.float32)
    (w1, b1), (w2, b2), (w3, b3), (w4, b4) = params
    h = jnp.maximum(h @ w1 + b1, 0.0)
    h = jnp.maximum(h @ w2 + b2, 0.0)
    h = h @ w3 + b3
    h = h @ w4 + b4
    return h


if __name__ == "__main__":
    key = jax.random.PRNGKey(0)
    kx, kp = jax.random.split(key)
    # MNIST-like NCHW input; forward's x.view(-1, 784) flattens it.
    x = jax.random.normal(kx, (2, 1, 28, 28), jnp.float32)
    params = init_params(kp)

    out = simple_nn_forward(x, params)
    out = jax.block_until_ready(out)

    ref = reference_forward(x, params)
    assert out.shape == (2, D_OUT), out.shape
    # bf16 MXU operands + fc3/fc4 folding -> small fp deviation vs the f32 reference.
    assert jnp.allclose(out, ref, atol=5e-2, rtol=5e-2), "mismatch vs reference"
    print("KERNEL_OK")
</pallas_src>

<mosaic_0001>
module attributes {stable_mosaic.version = 11 : i64} {
  func.func @mlp_kernel(%arg0: i32, %arg1: memref<8x784xbf16, #tpu.memory_space<vmem>>, %arg2: memref<784x128xbf16, #tpu.memory_space<vmem>>, %arg3: memref<1x128xf32, #tpu.memory_space<vmem>>, %arg4: memref<128x64xbf16, #tpu.memory_space<vmem>>, %arg5: memref<1x64xf32, #tpu.memory_space<vmem>>, %arg6: memref<64x10xbf16, #tpu.memory_space<vmem>>, %arg7: memref<1x10xf32, #tpu.memory_space<vmem>>, %arg8: memref<8x10xf32, #tpu.memory_space<vmem>>) attributes {dimension_semantics = [#tpu.dimension_semantics<parallel>], iteration_bounds = array<i64: 1>, scalar_prefetch = 0 : i64, scratch_operands = 0 : i64, tpu.core_type = #tpu.core_type<tc>, window_params = [{transform_indices = @transform_0, window_bounds = array<i64: 8, 784>}, {pipeline_mode = #tpu.pipeline_mode<synchronous>, transform_indices = @transform_1, window_bounds = array<i64: 784, 128>}, {pipeline_mode = #tpu.pipeline_mode<synchronous>, transform_indices = @transform_2, window_bounds = array<i64: 1, 128>}, {pipeline_mode = #tpu.pipeline_mode<synchronous>, transform_indices = @transform_3, window_bounds = array<i64: 128, 64>}, {pipeline_mode = #tpu.pipeline_mode<synchronous>, transform_indices = @transform_4, window_bounds = array<i64: 1, 64>}, {pipeline_mode = #tpu.pipeline_mode<synchronous>, transform_indices = @transform_5, window_bounds = array<i64: 64, 10>}, {pipeline_mode = #tpu.pipeline_mode<synchronous>, transform_indices = @transform_6, window_bounds = array<i64: 1, 10>}, {transform_indices = @transform_7, window_bounds = array<i64: 8, 10>}]} {
    %c0 = arith.constant 0 : index
    %c0_0 = arith.constant 0 : index
    %0 = vector.load %arg1[%c0, %c0_0] : memref<8x784xbf16, #tpu.memory_space<vmem>>, vector<8x784xbf16>
    %c0_1 = arith.constant 0 : index
    %c0_2 = arith.constant 0 : index
    %1 = vector.load %arg2[%c0_1, %c0_2] : memref<784x128xbf16, #tpu.memory_space<vmem>>, vector<784x128xbf16>
    %cst = arith.constant dense<0.000000e+00> : vector<8x128xf32>
    %2 = tpu.matmul %0, %1, %cst {dimension_numbers = #tpu.dot_dimension_numbers<[1], [0], [0], [1], [0, 0, 1, 1], [], []>} : vector<8x784xbf16>, vector<784x128xbf16>, vector<8x128xf32> -> vector<8x128xf32>
    %c0_3 = arith.constant 0 : index
    %c0_4 = arith.constant 0 : index
    %3 = vector.load %arg3[%c0_3, %c0_4] : memref<1x128xf32, #tpu.memory_space<vmem>>, vector<1x128xf32>
    %4 = vector.broadcast %3 : vector<1x128xf32> to vector<8x128xf32>
    %5 = arith.addf %2, %4 : vector<8x128xf32>
    %cst_5 = arith.constant 0.000000e+00 : f32
    %6 = vector.broadcast %cst_5 : f32 to vector<8x128xf32>
    %7 = arith.maximumf %5, %6 : vector<8x128xf32>
    %8 = arith.truncf %7 : vector<8x128xf32> to vector<8x128xbf16>
    %c0_6 = arith.constant 0 : index
    %c0_7 = arith.constant 0 : index
    %9 = vector.load %arg4[%c0_6, %c0_7] : memref<128x64xbf16, #tpu.memory_space<vmem>>, vector<128x64xbf16>
    %cst_8 = arith.constant dense<0.000000e+00> : vector<8x64xf32>
    %10 = tpu.matmul %8, %9, %cst_8 {dimension_numbers = #tpu.dot_dimension_numbers<[1], [0], [0], [1], [0, 0, 1, 1], [], []>} : vector<8x128xbf16>, vector<128x64xbf16>, vector<8x64xf32> -> vector<8x64xf32>
    %c0_9 = arith.constant 0 : index
    %c0_10 = arith.constant 0 : index
    %11 = vector.load %arg5[%c0_9, %c0_10] : memref<1x64xf32, #tpu.memory_space<vmem>>, vector<1x64xf32>
    %12 = vector.broadcast %11 : vector<1x64xf32> to vector<8x64xf32>
    %13 = arith.addf %10, %12 : vector<8x64xf32>
    %cst_11 = arith.constant 0.000000e+00 : f32
    %14 = vector.broadcast %cst_11 : f32 to vector<8x64xf32>
    %15 = arith.maximumf %13, %14 : vector<8x64xf32>
    %16 = arith.truncf %15 : vector<8x64xf32> to vector<8x64xbf16>
    %c0_12 = arith.constant 0 : index
    %c0_13 = arith.constant 0 : index
    %17 = vector.load %arg6[%c0_12, %c0_13] : memref<64x10xbf16, #tpu.memory_space<vmem>>, vector<64x10xbf16>
    %cst_14 = arith.constant dense<0.000000e+00> : vector<8x10xf32>
    %18 = tpu.matmul %16, %17, %cst_14 {dimension_numbers = #tpu.dot_dimension_numbers<[1], [0], [0], [1], [0, 0, 1, 1], [], []>} : vector<8x64xbf16>, vector<64x10xbf16>, vector<8x10xf32> -> vector<8x10xf32>
    %c0_15 = arith.constant 0 : index
    %c0_16 = arith.constant 0 : index
    %19 = vector.load %arg7[%c0_15, %c0_16] : memref<1x10xf32, #tpu.memory_space<vmem>>, vector<1x10xf32>
    %20 = vector.broadcast %19 : vector<1x10xf32> to vector<8x10xf32>
    %21 = arith.addf %18, %20 : vector<8x10xf32>
    %c0_17 = arith.constant 0 : index
    %c0_18 = arith.constant 0 : index
    %22 = vector.load %arg8[%c0_17, %c0_18] : memref<8x10xf32, #tpu.memory_space<vmem>>, vector<8x10xf32>
    tpu.vector_store %arg8[%c0_17, %c0_18], %21 {strides = array<i32>} : memref<8x10xf32, #tpu.memory_space<vmem>>, vector<8x10xf32>,
    return
  }
  func.func @transform_0(%arg0: i32) -> (i32, i32) {
    %c0_i32 = arith.constant 0 : i32
    %c0_i32_0 = arith.constant 0 : i32
    return %arg0, %c0_i32 : i32, i32
  }
  func.func @transform_1(%arg0: i32) -> (i32, i32) {
    %c0_i32 = arith.constant 0 : i32
    %c0_i32_0 = arith.constant 0 : i32
    %c0_i32_1 = arith.constant 0 : i32
    return %c0_i32, %c0_i32_0 : i32, i32
  }
  func.func @transform_2(%arg0: i32) -> (i32, i32) {
    %c0_i32 = arith.constant 0 : i32
    %c0_i32_0 = arith.constant 0 : i32
    %c0_i32_1 = arith.constant 0 : i32
    return %c0_i32, %c0_i32_0 : i32, i32
  }
  func.func @transform_3(%arg0: i32) -> (i32, i32) {
    %c0_i32 = arith.constant 0 : i32
    %c0_i32_0 = arith.constant 0 : i32
    %c0_i32_1 = arith.constant 0 : i32
    return %c0_i32, %c0_i32_0 : i32, i32
  }
  func.func @transform_4(%arg0: i32) -> (i32, i32) {
    %c0_i32 = arith.constant 0 : i32
    %c0_i32_0 = arith.constant 0 : i32
    %c0_i32_1 = arith.constant 0 : i32
    return %c0_i32, %c0_i32_0 : i32, i32
  }
  func.func @transform_5(%arg0: i32) -> (i32, i32) {
    %c0_i32 = arith.constant 0 : i32
    %c0_i32_0 = arith.constant 0 : i32
    %c0_i32_1 = arith.constant 0 : i32
    return %c0_i32, %c0_i32_0 : i32, i32
  }
  func.func @transform_6(%arg0: i32) -> (i32, i32) {
    %c0_i32 = arith.constant 0 : i32
    %c0_i32_0 = arith.constant 0 : i32
    %c0_i32_1 = arith.constant 0 : i32
    return %c0_i32, %c0_i32_0 : i32, i32
  }
  func.func @transform_7(%arg0: i32) -> (i32, i32) {
    %c0_i32 = arith.constant 0 : i32
    %c0_i32_0 = arith.constant 0 : i32
    return %arg0, %c0_i32 : i32, i32
  }
}

</mosaic_0001>

<bundles_post_ra>
// kernel: tpu_custom_call.1
= control target key start
LH: loop header
LB: loop body
LE: loop exit
PB: predicated region body
PF: predicated region fallthrough
CT: control target
= control target key end

     0   :  { %12 = vsyncpa [#allocation3], 0  ;;  %s1193_s0 = inlined_call_operand.vmem [shape: bf16[8,784], index: 0, kind: input, shape index: {}]   ;;  %s1194_s1 = inlined_call_operand.hbm [shape: bf16[784,128], index: 1, kind: input, shape index: {}]   ;;  %s1195_s2 = inlined_call_operand.vmem [shape: f32[1,128], index: 2, kind: input, shape index: {}]   ;;  %s1196_s3 = inlined_call_operand.vmem [shape: bf16[128,64], index: 3, kind: input, shape index: {}]   ;;  %s1197_s4 = inlined_call_operand.vmem [shape: f32[1,64], index: 4, kind: input, shape index: {}]   ;;  %s1198_s5 = inlined_call_operand.vmem [shape: bf16[64,10], index: 5, kind: input, shape index: {}]   ;;  %s1199_s6 = inlined_call_operand.vmem [shape: f32[1,10], index: 6, kind: input, shape index: {}]   ;;  %s1200_s7 = inlined_call_operand.hbm [shape: f32[8,10], index: 7, kind: output, shape index: {}]  }
   0x1   :  { %13 = vsyncpa [#allocation4], 0  ;;  %s20_s26 = sshll.u32 %s1194_s1, 4  ;;  %s1086_s27 = smov [#allocation2]   ;;  %s21_s26 = int_to_ptr.hbm [resolvable:$true] %s20_s26 }
   0x2   :  { %s22_s28 = sshll.u32 %s1086_s27, 4  ;;  %s1087_s29 = smov 64   ;;  %s23_s28 = int_to_ptr.vmem [resolvable:$true] %s22_s28 }
   0x3   :  { %s1088_s30 = smov 4  }
   0x4   :  { %28 = dma.hbm_to_vmem [thread:$0]  %s21_s26, 6272, %s23_s28, [#allocation3], %s1087_s29, %s1087_s29, %s1088_s30  }
   0x5   :  { %1082 = dma.done.wait [#allocation3], 6272  }
   0x6   :  { %1083 = vsyncadd [#allocation3], 4294961024  ;;  %v973_v0 = vld [vmem:[#allocation2 + $0x38] sm:$0xff]  ;;  %v972_v3 = vld [vmem:[#allocation2 + $0x30] sm:$0xff]  ;;  %vm468_vm0 = vcmask 130048   ;;  %vm684_vm1 = vcmask 523264  }
   0x7   :  { %v981_v1 = vld [vmem:[#allocation2 + $0x78] sm:$0xff]  ;;  %472 = vmatpush.bf16.msra.mxu0 %v973_v0  ;;  %v980_v4 = vld [vmem:[#allocation2 + $0x70] sm:$0xff]  ;;  %v971_v8 = vld [vmem:[#allocation2 + $0x28] sm:$0xff]  ;;  %s710_s20 = sshll.u32 %s1200_s7, 4  ;;  %vm701_vm2 = vcmask 80896   ;;  %s711_s20 = int_to_ptr.hbm [resolvable:$true] %s710_s20 }
   0x8   :  { %v989_v2 = vld [vmem:[#allocation2 + $0xb8] sm:$0xff]  ;;  %485 = vmatpush.bf16.msra.mxu1 %v981_v1  ;;  %v988_v5 = vld [vmem:[#allocation2 + $0xb0] sm:$0xff]  ;;  %v979_v9 = vld [vmem:[#allocation2 + $0x68] sm:$0xff] }
   0x9   :  { %498 = vmatpush.bf16.msra.mxu2 %v989_v2  ;;  %v997_v6 = vld [vmem:[#allocation2 + $0xf8] sm:$0xff]  ;;  %v996_v7 = vld [vmem:[#allocation2 + $0xf0] sm:$0xff]  ;;  %v987_v10 = vld [vmem:[#allocation2 + $0xa8] sm:$0xff] }
   0xa   :  { %511 = vmatpush.bf16.msra.mxu3 %v997_v6  ;;  %v995_v11 = vld [vmem:[#allocation2 + $0xe8] sm:$0xff]  ;;  %v970_v12 = vld [vmem:[#allocation2 + $0x20] sm:$0xff]  ;;  %v969_v16 = vld [vmem:[#allocation2 + $0x18] sm:$0xff] }
   0xb   :  { %473 = vmatpush.bf16.msra.mxu0 %v972_v3  ;;  %v978_v13 = vld [vmem:[#allocation2 + $0x60] sm:$0xff]  ;;  %v977_v17 = vld [vmem:[#allocation2 + $0x58] sm:$0xff]  ;;  %v968_v20 = vld [vmem:[#allocation2 + $0x10] sm:$0xff] }
   0xc   :  { %486 = vmatpush.bf16.msra.mxu1 %v980_v4  ;;  %v986_v14 = vld [vmem:[#allocation2 + $0xa0] sm:$0xff]  ;;  %v985_v18 = vld [vmem:[#allocation2 + $0x98] sm:$0xff]  ;;  %v976_v21 = vld [vmem:[#allocation2 + $0x50] sm:$0xff] }
   0xd   :  { %499 = vmatpush.bf16.msra.mxu2 %v988_v5  ;;  %v994_v15 = vld [vmem:[#allocation2 + $0xe0] sm:$0xff]  ;;  %v993_v19 = vld [vmem:[#allocation2 + $0xd8] sm:$0xff]  ;;  %v984_v22 = vld [vmem:[#allocation2 + $0x90] sm:$0xff] }
   0xe   :  { %512 = vmatpush.bf16.msra.mxu3 %v996_v7  ;;  %v992_v23 = vld [vmem:[#allocation2 + $0xd0] sm:$0xff]  ;;  %v967_v24 = vld [vmem:[#allocation2 + $0x8] sm:$0xff]  ;;  %v44_v26 = vld [vmem:[%s1193_s0] sm:$0xff] }
   0xf   :  { %474 = vmatpush.bf16.msra.mxu0 %v971_v8  ;;  %v975_v25 = vld [vmem:[#allocation2 + $0x48] sm:$0xff]  ;;  %v154_v29 = vunpack.c.l.b16 %v44_v26  ;;  %v155_v31 = vunpack.c.h.b16 %v44_v26  ;;  %v966_v32 = vld [vmem:[#allocation2] sm:$0xff]  ;;  %v1005_v34 = vld [vmem:[#allocation2 + $0x138] sm:$0xff] }
  0x10   :  { %487 = vmatpush.bf16.msra.mxu1 %v979_v9  ;;  %v983_v27 = vld [vmem:[#allocation2 + $0x88] sm:$0xff]  ;;  %v974_v33 = vld [vmem:[#allocation2 + $0x40] sm:$0xff]  ;;  %v1013_v35 = vld [vmem:[#allocation2 + $0x178] sm:$0xff] }
  0x11   :  { %500 = vmatpush.bf16.msra.mxu2 %v987_v10  ;;  %v45_v28 = vld [vmem:[%s1193_s0 + $0x8] sm:$0xff]  ;;  %v982_v36 = vld [vmem:[#allocation2 + $0x80] sm:$0xff]  ;;  %v161_v38 = vpack.c.b16 %v154_v29, %v154_v29  ;;  %v162_v39 = vpack.c.b16 %v155_v31, %v155_v31  ;;  %v1004_v43 = vld [vmem:[#allocation2 + $0x130] sm:$0xff] }
  0x12   :  { %513 = vmatpush.bf16.msra.mxu3 %v995_v11  ;;  %v991_v30 = vld [vmem:[#allocation2 + $0xc8] sm:$0xff]  ;;  %v156_v37 = vunpack.c.l.b16 %v45_v28  ;;  %v157_v40 = vunpack.c.h.b16 %v45_v28  ;;  %v990_v41 = vld [vmem:[#allocation2 + $0xc0] sm:$0xff]  ;;  %v1012_v44 = vld [vmem:[#allocation2 + $0x170] sm:$0xff] }
  0x13   :  { %475 = vmatpush.bf16.msra.mxu0 %v970_v12  ;;  %v1014_v42 = vld [vmem:[#allocation2 + $0x180] sm:$0xff]  ;;  %v1003_v47 = vld [vmem:[#allocation2 + $0x128] sm:$0xff]  ;;  %v47_v51 = vld [vmem:[%s1193_s0 + $0x18] sm:$0xf] }
  0x14   :  { %488 = vmatpush.bf16.msra.mxu1 %v978_v13  ;;  %v163_v45 = vpack.c.b16 %v156_v37, %v156_v37  ;;  %v164_v46 = vpack.c.b16 %v157_v40, %v157_v40  ;;  %v1011_v48 = vld [vmem:[#allocation2 + $0x168] sm:$0xff]  ;;  %v1002_v49 = vld [vmem:[#allocation2 + $0x120] sm:$0xff]  ;;  %v1001_v52 = vld [vmem:[#allocation2 + $0x118] sm:$0xff]  ;;  %v160_v54 = vunpack.c.l.b16 %v47_v51 }
  0x15   :  { %501 = vmatpush.bf16.msra.mxu2 %v986_v14  ;;  %v1010_v50 = vld [vmem:[#allocation2 + $0x160] sm:$0xff]  ;;  %v1009_v53 = vld [vmem:[#allocation2 + $0x158] sm:$0xff]  ;;  %v1000_v55 = vld [vmem:[#allocation2 + $0x110] sm:$0xff] }
  0x16   :  { %514 = vmatpush.bf16.msra.mxu3 %v994_v15  ;;  %v1008_v56 = vld [vmem:[#allocation2 + $0x150] sm:$0xff]  ;;  %v167_v57 = vpack.c.b16 %v160_v54, %v160_v54  ;;  %v999_v58 = vld [vmem:[#allocation2 + $0x108] sm:$0xff]  ;;  %v998_v63 = vld [vmem:[#allocation2 + $0x100] sm:$0xff] }
  0x17   :  { %476 = vmatpush.bf16.msra.mxu0 %v969_v16  ;;  %v1007_v59 = vld [vmem:[#allocation2 + $0x148] sm:$0xff]  ;;  %v46_v60 = vld [vmem:[%s1193_s0 + $0x10] sm:$0xff]  ;;  %v1006_v0 = vld [vmem:[#allocation2 + $0x140] sm:$0xff]  ;;  %s1089_s0 = smov [#allocation5]  }
  0x18   :  { %489 = vmatpush.bf16.msra.mxu1 %v977_v17  ;;  %v158_v61 = vunpack.c.l.b16 %v46_v60  ;;  %v159_v62 = vunpack.c.h.b16 %v46_v60  ;;  %v1022_v3 = vld [vmem:[%s1196_s3 + $0x38] sm:$0xff]  ;;  %v1021_v4 = vld [vmem:[%s1196_s3 + $0x30] sm:$0xff]  ;;  %v1020_v5 = vld [vmem:[%s1196_s3 + $0x28] sm:$0xff]  ;;  %s708_s18 = sshll.u32 %s1089_s0, 4  ;;  %s709_s18 = int_to_ptr.vmem [resolvable:$true] %s708_s18 }
  0x19   :  { %502 = vmatpush.bf16.msra.mxu2 %v985_v18  ;;  %v1019_v6 = vld [vmem:[%s1196_s3 + $0x20] sm:$0xff]  ;;  %v1018_v7 = vld [vmem:[%s1196_s3 + $0x18] sm:$0xff]  ;;  %v1017_v8 = vld [vmem:[%s1196_s3 + $0x10] sm:$0xff] }
  0x1a   :  { %515 = vmatpush.bf16.msra.mxu3 %v993_v19  ;;  %v165_v1 = vpack.c.b16 %v158_v61, %v158_v61  ;;  %v166_v2 = vpack.c.b16 %v159_v62, %v159_v62  ;;  %v1016_v9 = vld [vmem:[%s1196_s3 + $0x8] sm:$0xff]  ;;  %v1015_v12 = vld [vmem:[%s1196_s3] sm:$0xff]  ;;  %v1026_v15 = vld [vmem:[%s1198_s5 + $0x18] sm:$0xff] }
  0x1b   :  { %477 = vmatpush.bf16.msra.mxu0 %v968_v20  ;;  %v1025_v18 = vld [vmem:[%s1198_s5 + $0x10] sm:$0xff]  ;;  %v1031_v19 = vld [vmem:[%s1195_s2] ss:$0 sm:$0xff]  ;;  %v1024_v20 = vld [vmem:[%s1198_s5 + $0x8] sm:$0xff] }
  0x1c   :  { %490 = vmatpush.bf16.msra.mxu1 %v976_v21 }
  0x1d   :  { %503 = vmatpush.bf16.msra.mxu2 %v984_v22 }
  0x1e   :  { %516 = vmatpush.bf16.msra.mxu3 %v992_v23 }
  0x1f   :  { %478 = vmatpush.bf16.msra.mxu0 %v967_v24 }
  0x20   :  { %491 = vmatpush.bf16.msra.mxu1 %v975_v25 }
  0x21   :  { %504 = vmatpush.bf16.msra.mxu2 %v983_v27 }
  0x22   :  { %517 = vmatpush.bf16.msra.mxu3 %v991_v30 }
  0x23   :  { %479 = vmatpush.bf16.msra.mxu0 %v966_v32 }
  0x24   :  { %492 = vmatpush.bf16.msra.mxu1 %v974_v33 }
  0x25   :  { %505 = vmatpush.bf16.msra.mxu2 %v982_v36 }
  0x26   :  { %480 = vmatmul.bf16.vlgmr.msra.gmra.mxu0 %v161_v38  ;;  %518 = vmatpush.bf16.msra.mxu3 %v990_v41  ;;  %v1023_v38 = vld [vmem:[%s1198_s5] sm:$0xff] }
  0x27   :  { %524 = vmatpush.bf16.msrb.mxu0 %v1005_v34  ;;  %493 = vmatmul.bf16.vlgmr.msra.gmra.mxu1 %v162_v39  ;;  %v1032_v39 = vld [vmem:[%s1197_s4] ss:$0 sm:$0xff] }
  0x28   :  { %537 = vmatpush.bf16.msrb.mxu1 %v1013_v35  ;;  %506 = vmatmul.bf16.vlgmr.msra.gmra.mxu2 %v163_v45  ;;  %v1033_v45 = vld [vmem:[%s1199_s6] ss:$0 sm:$0xff] }
  0x29   :  { %557 = vmatpush.bf16.msrb.mxu2 %v1014_v42  ;;  %519 = vmatmul.bf16.vlgmr.msra.gmra.mxu3 %v164_v46 }
  0x2a   :  { %633 = vmatpush.bf16.msrb.mxu3 %v1022_v3 }
  0x2b   :  { %525 = vmatpush.bf16.msrb.mxu0 %v1004_v43 }
  0x2c   :  { %538 = vmatpush.bf16.msrb.mxu1 %v1012_v44 }
  0x2d   :  { %692 = vmatpush.bf16.msra.mxu2 %v1026_v15 }
  0x2e   :  { %634 = vmatpush.bf16.msrb.mxu3 %v1021_v4 }
  0x2f   :  { %526 = vmatpush.bf16.msrb.mxu0 %v1003_v47 }
  0x30   :  { %539 = vmatpush.bf16.msrb.mxu1 %v1011_v48 }
  0x31   :  { %693 = vmatpush.bf16.msra.mxu2 %v1025_v18 }
  0x32   :  { %635 = vmatpush.bf16.msrb.mxu3 %v1020_v5 }
  0x33   :  { %527 = vmatpush.bf16.msrb.mxu0 %v1002_v49 }
  0x34   :  { %540 = vmatpush.bf16.msrb.mxu1 %v1010_v50 }
  0x35   :  { %694 = vmatpush.bf16.msra.mxu2 %v1024_v20 }
  0x36   :  { %636 = vmatpush.bf16.msrb.mxu3 %v1019_v6 }
  0x37   :  { %528 = vmatpush.bf16.msrb.mxu0 %v1001_v52 }
  0x38   :  { %541 = vmatpush.bf16.msrb.mxu1 %v1009_v53  ;;  %916 = vmatmul.msk.bf16.vlgmr.msrb.gmra.mxu2 %vm468_vm0, %v167_v57 }
  0x39   :  { %695 = vmatpush.bf16.msra.mxu2 %v1023_v38 }
  0x3a   :  { %637 = vmatpush.bf16.msrb.mxu3 %v1018_v7 }
  0x3b   :  { %529 = vmatpush.bf16.msrb.mxu0 %v1000_v55 }
  0x3c   :  { %542 = vmatpush.bf16.msrb.mxu1 %v1008_v56 }
  0x3e   :  { %638 = vmatpush.bf16.msrb.mxu3 %v1017_v8 }
  0x3f   :  { %530 = vmatpush.bf16.msrb.mxu0 %v999_v58 }
  0x40   :  { %543 = vmatpush.bf16.msrb.mxu1 %v1007_v59 }
  0x42   :  { %639 = vmatpush.bf16.msrb.mxu3 %v1016_v9 }
  0x43   :  { %531 = vmatpush.bf16.msrb.mxu0 %v998_v63 }
  0x44   :  { %544 = vmatpush.bf16.msrb.mxu1 %v1006_v0 }
  0x46   :  { %532 = vmatmul.bf16.vlgmr.msrb.gmra.mxu0 %v165_v1  ;;  %640 = vmatpush.bf16.msrb.mxu3 %v1015_v12 }
  0x47   :  { %545 = vmatmul.bf16.vlgmr.msrb.gmra.mxu1 %v166_v2 }
  0xa3   :  { %v481_v10 = vpop.f32.mrf.mxu0 }
  0xa4   :  { %v494_v11 = vpop.f32.mrf.mxu1  ;;  %v482_v21 = vadd.f32 %v1031_v19, %v481_v10 }
  0xa6   :  { %v495_v24 = vadd.f32 %v494_v11, %v482_v21 }
  0xab   :  { %v483_v13 = vpop.f32.mrf.mxu0  ;;  %v507_v16 = vpop.f32.mrf.mxu2 }
  0xac   :  { %v496_v14 = vpop.f32.mrf.mxu1  ;;  %v520_v17 = vpop.f32.mrf.mxu3  ;;  %v508_v25 = vadd.f32 %v507_v16, %v495_v24 }
  0xae   :  { %v521_v27 = vadd.f32 %v520_v17, %v508_v25 }
  0xb3   :  { %v509_v22 = vpop.f32.mrf.mxu2 }
  0xb4   :  { %v522_v23 = vpop.f32.mrf.mxu3 }
  0xbb   :  { %v559_v26 = vpop.f32.mrf.mxu2 }
  0xc3   :  { %v533_v28 = vpop.f32.mrf.mxu0  ;;  %v561_v32 = vpop.f32.mrf.mxu2 }
  0xc4   :  { %v546_v29 = vpop.f32.mrf.mxu1  ;;  %v534_v30 = vadd.f32 %v533_v28, %v521_v27 }
  0xc6   :  { %v547_v31 = vadd.f32 %v546_v29, %v534_v30 }
  0xc8   :  { %v560_v33 = vadd.f32 %v559_v26, %v547_v31 }
  0xca   :  { %v563_v34 = vmax.f32 %v560_v33, 0.0 }
  0xcb   :  { %v535_v35 = vpop.f32.mrf.mxu0 }
  0xcc   :  { %v548_v36 = vpop.f32.mrf.mxu1  ;;  %v564_v37 = vpack.c.bf16 %v563_v34, %v563_v34 }
  0xce   :  { %641 = vmatmul.bf16.vlgmr.msrb.gmra.mxu3 %v564_v37 }
 0x151   :  { %v642_v40 = vpop.f32.mrf.mxu3 }
 0x152   :  { %v643_v41 = vadd.f32 %v1032_v39, %v642_v40 }
 0x154   :  { %v646_v42 = vmax.f32 %v643_v41, 0.0 }
 0x156   :  { %v647_v43 = vpack.c.bf16 %v646_v42, %v646_v42 }
 0x158   :  { %965 = vmatmul.msk.bf16.vlgmr.msra.gmra.mxu2 %vm684_vm1, %v647_v43 }
 0x159   :  { %v644_v44 = vpop.f32.mrf.mxu3 }
 0x1db   :  { %v697_v46 = vpop.f32.mrf.mxu2 }
 0x1dc   :  { %v698_v47 = vadd.f32 %v1033_v45, %v697_v46 }
 0x1de   :  { %702 = vst.msk [vmem:[#allocation5] sm:$0xff] %vm701_vm2, %v698_v47 }
 0x1df   :  { %713 = dma.vmem_to_hbm [thread:$0]  %s709_s18, 128, %s711_s20, [#allocation4]  }
 0x1e3   :  { %v699_v48 = vpop.f32.mrf.mxu2 }
 0x1e4   :  { %1084 = dma.done.wait [#allocation4], 128  }
 0x1e5   :  { %1085 = vsyncadd [#allocation4], 4294967168 }
 0x1e6   :  { %718 = vsyncpa [#allocation3], 1 }
 0x1e7   :  { %719 = vsyncpa [#allocation4], 1 }

</bundles_post_ra>
